<compile_context>
chip_gen: v7x
topology: tpu7x:2x2x1
jax: 0.10.0
libtpu: 0.0.40
codegen_flags: <defaults>
</compile_context>

<pallas_src>
import functools

import jax
import jax.numpy as jnp
from jax.experimental import pallas as pl
from jax.experimental.pallas import tpu as pltpu

EPS = 1e-5  # nn.BatchNorm1d default eps
EXPANSION = 4


# ------------------------------ Pallas kernel -------------------------------

def _bottleneck_kernel(stride, has_downsample, B, L, Lout,
                       x_ref, w1_ref, b1_ref, w2_ref, b2_ref, w3_ref, b3_ref,
                       *rest):
    """Fused Bottleneck forward for B samples, rows flattened to (B*L, C)."""
    i = 0
    if has_downsample:
        wd_ref, bd_ref = rest[0], rest[1]
        i = 2
    o_ref = rest[i]
    h2s_ref = rest[i + 1] if stride > 1 else None

    BL = B * L
    x = x_ref[...]                                   # (B*L, Cin) f32
    xb = x.astype(jnp.bfloat16)

    # ---- conv1 (1x1) + bn1 + relu ; BN scale folded into w1, shift in b1 ----
    h1 = jnp.dot(xb, w1_ref[...], preferred_element_type=jnp.float32)  # (B*L, W)
    h1b = jnp.maximum(h1 + b1_ref[...], 0.0).astype(jnp.bfloat16)

    # ---- conv2 (3-tap, pad=1): unshifted matmuls + XLU rolls + edge masks ---
    y0 = jnp.dot(h1b, w2_ref[0], preferred_element_type=jnp.float32)
    y1 = jnp.dot(h1b, w2_ref[1], preferred_element_type=jnp.float32)
    y2 = jnp.dot(h1b, w2_ref[2], preferred_element_type=jnp.float32)

    row = jax.lax.broadcasted_iota(jnp.int32, (BL, 1), 0)
    pos = jnp.bitwise_and(row, L - 1) if (L & (L - 1)) == 0 else row % L
    left = jnp.where(pos != 0, pltpu.roll(y0, 1, axis=0), 0.0)        # y0[i-1]
    right = jnp.where(pos != L - 1, pltpu.roll(y2, BL - 1, axis=0), 0.0)  # y2[i+1]
    h2 = jnp.maximum(left + y1 + right + b2_ref[...], 0.0)           # (B*L, W)

    # ---- stride folded via strided VMEM reads (no selection matmul) ---------
    if stride > 1:
        h2s_ref[...] = h2
        h2b = h2s_ref[pl.ds(0, B * Lout, stride=stride), :].astype(jnp.bfloat16)
    else:
        h2b = h2.astype(jnp.bfloat16)

    # ---- conv3 (1x1) + bn3 --------------------------------------------------
    y = jnp.dot(h2b, w3_ref[...], preferred_element_type=jnp.float32) + b3_ref[...]

    # ---- shortcut: identity or downsample (1x1, stride) + bnd ---------------
    if has_downsample:
        if stride > 1:
            xs = x_ref[pl.ds(0, B * Lout, stride=stride), :].astype(jnp.bfloat16)
        else:
            xs = xb
        identity = jnp.dot(xs, wd_ref[...],
                           preferred_element_type=jnp.float32) + bd_ref[...]
    else:
        identity = x                                  # Cin == Cout, stride == 1

    o_ref[...] = jnp.maximum(y + identity, 0.0).astype(o_ref.dtype)


# ------------------------------ wrapped call ---------------------------------

def _pick_batch_tile(N, L):
    """Aim for >=256 rows per matmul (feed the MXU), bounded by N and VMEM."""
    target_rows, max_rows = 256, 2048
    bt = max(1, min(N, pl.cdiv(target_rows, L), max(1, max_rows // L)))
    while N % bt:
        bt -= 1
    # keep >=2 grid steps (v7x megacore gets both TCs) if that leaves >=128 rows
    if bt == N and N % 2 == 0 and (N // 2) * L >= 128:
        bt = N // 2
    return bt


def bottleneck_forward_nlc(folded, x_nlc, batch_tile=None):
    """Channels-last forward.  x_nlc: (N, L, Cin) f32 -> (N, Lout, Cout) f32."""
    stride = folded['stride']
    has_downsample = 'wd' in folded
    N, L, Cin = x_nlc.shape
    W = folded['w1'].shape[1]
    Cout = folded['w3'].shape[1]
    if stride > 1:
        assert L % stride == 0, "TODO(synk): L % stride != 0 not implemented"
    Lout = L // stride
    if not has_downsample:
        assert stride == 1 and Cin == Cout, "identity shortcut requires matching shapes"

    bt = batch_tile if batch_tile is not None else _pick_batch_tile(N, L)
    assert N % bt == 0
    grid = N // bt
    if grid > 1:
        assert (bt * L) % 8 == 0 and (bt * Lout) % 8 == 0, "row tiles must be sublane-aligned"

    # flattened channels-last rows: lane axis = channels (lane-dense Cout output)
    x2d = x_nlc.reshape(N * L, Cin).astype(jnp.float32)

    args = [x2d, folded['w1'], folded['b1'], folded['w2'], folded['b2'],
            folded['w3'], folded['b3']]
    in_specs = [
        pl.BlockSpec((bt * L, Cin), lambda n: (n, 0)),
        pl.BlockSpec((Cin, W), lambda n: (0, 0)),
        pl.BlockSpec((1, W), lambda n: (0, 0)),
        pl.BlockSpec((3, W, W), lambda n: (0, 0, 0)),
        pl.BlockSpec((1, W), lambda n: (0, 0)),
        pl.BlockSpec((W, Cout), lambda n: (0, 0)),
        pl.BlockSpec((1, Cout), lambda n: (0, 0)),
    ]
    if has_downsample:
        args += [folded['wd'], folded['bd']]
        in_specs += [pl.BlockSpec((Cin, Cout), lambda n: (0, 0)),
                     pl.BlockSpec((1, Cout), lambda n: (0, 0))]

    scratch_shapes = [pltpu.VMEM((bt * L, W), jnp.float32)] if stride > 1 else []

    flops = (2 * N * L * Cin * W                       # conv1
             + 3 * 2 * N * L * W * W                   # conv2 (3 taps)
             + 2 * N * Lout * W * Cout                 # conv3
             + (2 * N * Lout * Cin * Cout if has_downsample else 0))
    bytes_accessed = int(sum(a.size * a.dtype.itemsize for a in args)
                         + N * Lout * Cout * 4)

    kernel = functools.partial(_bottleneck_kernel, stride, has_downsample, bt, L, Lout)

    out = pl.pallas_call(
        kernel,
        out_shape=jax.ShapeDtypeStruct((N * Lout, Cout), jnp.float32),
        grid_spec=pltpu.PrefetchScalarGridSpec(
            num_scalar_prefetch=0,
            grid=(grid,),                              # batch-tile axis
            in_specs=in_specs,
            out_specs=pl.BlockSpec((bt * Lout, Cout), lambda n: (n, 0)),
            scratch_shapes=scratch_shapes),
        compiler_params=pltpu.CompilerParams(
            dimension_semantics=("parallel",)),        # v7x: shard over 2 TCs
        cost_estimate=pl.CostEstimate(flops=flops, transcendentals=0,
                                      bytes_accessed=bytes_accessed),
    )(*args)
    return out.reshape(N, Lout, Cout)


def bottleneck_forward(folded, x_ncl, batch_tile=None):
    """PyTorch-layout wrapper: (N, Cin, L) -> (N, Cout, Lout).  When chaining
    blocks, prefer bottleneck_forward_nlc and transpose only at the boundary."""
    y = bottleneck_forward_nlc(folded, jnp.transpose(x_ncl, (0, 2, 1)), batch_tile)
    return jnp.transpose(y, (0, 2, 1))


# ------------------------------- parameters ----------------------------------

def init_bn(key, c):
    kg, kb, km, kv = jax.random.split(key, 4)
    return dict(gamma=1.0 + 0.1 * jax.random.normal(kg, (c,), jnp.float32),
                beta=0.1 * jax.random.normal(kb, (c,), jnp.float32),
                mean=0.1 * jax.random.normal(km, (c,), jnp.float32),
                var=jax.random.uniform(kv, (c,), jnp.float32, 0.5, 1.5))


def init_conv(key, cout, cin, k):
    std = (2.0 / (cin * k)) ** 0.5
    return jax.random.normal(key, (cout, cin, k), jnp.float32) * std


def init_bottleneck_params(key, inplanes, planes, stride=1, base_width=64, groups=1):
    width = int(planes * (base_width / 64.0)) * groups
    keys = jax.random.split(key, 8)
    p = dict(stride=stride,
             conv1=init_conv(keys[0], width, inplanes, 1), bn1=init_bn(keys[1], width),
             conv2=init_conv(keys[2], width, width, 3), bn2=init_bn(keys[3], width),
             conv3=init_conv(keys[4], planes * EXPANSION, width, 1),
             bn3=init_bn(keys[5], planes * EXPANSION))
    if stride != 1 or inplanes != planes * EXPANSION:
        p['convd'] = init_conv(keys[6], planes * EXPANSION, inplanes, 1)
        p['bnd'] = init_bn(keys[7], planes * EXPANSION)
    return p


def fold_bn(bn):
    scale = bn['gamma'] * jax.lax.rsqrt(bn['var'] + EPS)
    shift = bn['beta'] - bn['mean'] * scale
    return scale, shift


def fold_bottleneck_params(p):
    """Precompute MXU-ready bf16 weight matrices (BN scale folded in) and f32
    bias rows (BN shift). Done ONCE, outside the forward graph."""
    s1, c1 = fold_bn(p['bn1'])
    s2, c2 = fold_bn(p['bn2'])
    s3, c3 = fold_bn(p['bn3'])
    f = dict(
        stride=p['stride'],
        w1=(p['conv1'][:, :, 0] * s1[:, None]).T.astype(jnp.bfloat16),           # (Cin, W)
        b1=c1.reshape(1, -1).astype(jnp.float32),
        w2=(jnp.transpose(p['conv2'], (2, 1, 0)) * s2[None, None, :]
            ).astype(jnp.bfloat16),                                              # (3, W, W)
        b2=c2.reshape(1, -1).astype(jnp.float32),
        w3=(p['conv3'][:, :, 0] * s3[:, None]).T.astype(jnp.bfloat16),           # (W, Cout)
        b3=c3.reshape(1, -1).astype(jnp.float32),
    )
    if 'convd' in p:
        sd, cd = fold_bn(p['bnd'])
        f['wd'] = (p['convd'][:, :, 0] * sd[:, None]).T.astype(jnp.bfloat16)     # (Cin, Cout)
        f['bd'] = cd.reshape(1, -1).astype(jnp.float32)
    return f


# -------------------------- pure-JAX reference --------------------------------

def bottleneck_reference_nlc(folded, x_nlc):
    """f32 reference using the same folded (bf16-stored) weights."""
    s = folded['stride']
    f32 = lambda a: a.astype(jnp.float32)
    x = f32(x_nlc)
    L = x.shape[1]
    h1 = jax.nn.relu(jnp.einsum('nlc,cw->nlw', x, f32(folded['w1'])) + folded['b1'][0])
    h1p = jnp.pad(h1, ((0, 0), (1, 1), (0, 0)))
    w2 = f32(folded['w2'])
    h2 = sum(jnp.einsum('nlw,wv->nlv', h1p[:, k:k + L, :], w2[k]) for k in range(3))
    h2 = jax.nn.relu(h2 + folded['b2'][0])[:, ::s, :]
    y = jnp.einsum('nlw,wc->nlc', h2, f32(folded['w3'])) + folded['b3'][0]
    if 'wd' in folded:
        identity = jnp.einsum('nlc,cd->nld', x[:, ::s, :], f32(folded['wd'])) + folded['bd'][0]
    else:
        identity = x
    return jax.nn.relu(y + identity)


# ----------------------------------- main ------------------------------------

if __name__ == "__main__":
    key = jax.random.PRNGKey(0)
    k1, k2, k3, kx = jax.random.split(key, 4)

    N, L = 2, 32
    # A: projection shortcut (channel expansion), stride 1
    pa = fold_bottleneck_params(init_bottleneck_params(k1, inplanes=64, planes=32, stride=1))
    # B: identity shortcut (inplanes == planes*4), stride 1
    pb = fold_bottleneck_params(init_bottleneck_params(k2, inplanes=128, planes=32, stride=1))
    # C: strided projection shortcut, stride 2
    pc = fold_bottleneck_params(init_bottleneck_params(k3, inplanes=128, planes=64, stride=2))

    x_ncl = jax.random.normal(kx, (N, 64, L), jnp.float32)   # PyTorch (N, Cin, L)

    # channels-last only at the network boundary; blocks chain in (N, L, C)
    x = jnp.transpose(x_ncl, (0, 2, 1))                      # (2, 32, 64)
    ya = bottleneck_forward_nlc(pa, x)                       # (2, 32, 128)
    yb = bottleneck_forward_nlc(pb, ya)                      # (2, 32, 128)
    yc = bottleneck_forward_nlc(pc, yb)                      # (2, 16, 256)
    yc = jax.block_until_ready(yc)
    yc_ncl = jnp.transpose(yc, (0, 2, 1))                    # back to (N, Cout, Lout)

    assert ya.shape == (N, L, 128), ya.shape
    assert yb.shape == (N, L, 128), yb.shape
    assert yc_ncl.shape == (N, 256, L // 2), yc_ncl.shape
    assert bool(jnp.all(jnp.isfinite(ya)))
    assert bool(jnp.all(jnp.isfinite(yb)))
    assert bool(jnp.all(jnp.isfinite(yc)))

    # per-block numerical check vs pure-JAX reference (bf16 MXU => loose tol)
    ra = bottleneck_reference_nlc(pa, x)
    rb = bottleneck_reference_nlc(pb, ya)
    rc = bottleneck_reference_nlc(pc, yb)
    for got, ref in ((ya, ra), (yb, rb), (yc, rc)):
        err = float(jnp.max(jnp.abs(got - ref)) / (jnp.max(jnp.abs(ref)) + 1e-6))
        assert err < 0.06, f"max relative error too large: {err}"

    print("KERNEL_OK")
</pallas_src>

<mosaic_0001>
module attributes {stable_mosaic.version = 11 : i64} {
  func.func @_bottleneck_kernel(%arg0: i32, %arg1: memref<64x64xf32, #tpu.memory_space<vmem>>, %arg2: memref<64x32xbf16, #tpu.memory_space<vmem>>, %arg3: memref<1x32xf32, #tpu.memory_space<vmem>>, %arg4: memref<3x32x32xbf16, #tpu.memory_space<vmem>>, %arg5: memref<1x32xf32, #tpu.memory_space<vmem>>, %arg6: memref<32x128xbf16, #tpu.memory_space<vmem>>, %arg7: memref<1x128xf32, #tpu.memory_space<vmem>>, %arg8: memref<64x128xbf16, #tpu.memory_space<vmem>>, %arg9: memref<1x128xf32, #tpu.memory_space<vmem>>, %arg10: memref<64x128xf32, #tpu.memory_space<vmem>>) attributes {dimension_semantics = [#tpu.dimension_semantics<parallel>], iteration_bounds = array<i64: 1>, scalar_prefetch = 0 : i64, scratch_operands = 0 : i64, tpu.core_type = #tpu.core_type<tc>, window_params = [{transform_indices = @transform_0, window_bounds = array<i64: 64, 64>}, {pipeline_mode = #tpu.pipeline_mode<synchronous>, transform_indices = @transform_1, window_bounds = array<i64: 64, 32>}, {pipeline_mode = #tpu.pipeline_mode<synchronous>, transform_indices = @transform_2, window_bounds = array<i64: 1, 32>}, {pipeline_mode = #tpu.pipeline_mode<synchronous>, transform_indices = @transform_3, window_bounds = array<i64: 3, 32, 32>}, {pipeline_mode = #tpu.pipeline_mode<synchronous>, transform_indices = @transform_4, window_bounds = array<i64: 1, 32>}, {pipeline_mode = #tpu.pipeline_mode<synchronous>, transform_indices = @transform_5, window_bounds = array<i64: 32, 128>}, {pipeline_mode = #tpu.pipeline_mode<synchronous>, transform_indices = @transform_6, window_bounds = array<i64: 1, 128>}, {pipeline_mode = #tpu.pipeline_mode<synchronous>, transform_indices = @transform_7, window_bounds = array<i64: 64, 128>}, {pipeline_mode = #tpu.pipeline_mode<synchronous>, transform_indices = @transform_8, window_bounds = array<i64: 1, 128>}, {transform_indices = @transform_9, window_bounds = array<i64: 64, 128>}]} {
    %c0 = arith.constant 0 : index
    %c0_0 = arith.constant 0 : index
    %0 = vector.load %arg1[%c0, %c0_0] : memref<64x64xf32, #tpu.memory_space<vmem>>, vector<64x64xf32>
    %1 = arith.truncf %0 : vector<64x64xf32> to vector<64x64xbf16>
    %c0_1 = arith.constant 0 : index
    %c0_2 = arith.constant 0 : index
    %2 = vector.load %arg2[%c0_1, %c0_2] : memref<64x32xbf16, #tpu.memory_space<vmem>>, vector<64x32xbf16>
    %cst = arith.constant dense<0.000000e+00> : vector<64x32xf32>
    %3 = tpu.matmul %1, %2, %cst {dimension_numbers = #tpu.dot_dimension_numbers<[1], [0], [0], [1], [0, 0, 1, 1], [], []>} : vector<64x64xbf16>, vector<64x32xbf16>, vector<64x32xf32> -> vector<64x32xf32>
    %c0_3 = arith.constant 0 : index
    %c0_4 = arith.constant 0 : index
    %4 = vector.load %arg3[%c0_3, %c0_4] : memref<1x32xf32, #tpu.memory_space<vmem>>, vector<1x32xf32>
    %5 = vector.broadcast %4 : vector<1x32xf32> to vector<64x32xf32>
    %6 = arith.addf %3, %5 : vector<64x32xf32>
    %cst_5 = arith.constant 0.000000e+00 : f32
    %7 = vector.broadcast %cst_5 : f32 to vector<64x32xf32>
    %8 = arith.maximumf %6, %7 : vector<64x32xf32>
    %9 = arith.truncf %8 : vector<64x32xf32> to vector<64x32xbf16>
    %c0_6 = arith.constant 0 : index
    %c0_7 = arith.constant 0 : index
    %c0_8 = arith.constant 0 : index
    %10 = vector.load %arg4[%c0_6, %c0_7, %c0_8] : memref<3x32x32xbf16, #tpu.memory_space<vmem>>, vector<1x32x32xbf16>
    %11 = vector.shape_cast %10 : vector<1x32x32xbf16> to vector<32x32xbf16>
    %cst_9 = arith.constant dense<0.000000e+00> : vector<64x32xf32>
    %12 = tpu.matmul %9, %11, %cst_9 {dimension_numbers = #tpu.dot_dimension_numbers<[1], [0], [0], [1], [0, 0, 1, 1], [], []>} : vector<64x32xbf16>, vector<32x32xbf16>, vector<64x32xf32> -> vector<64x32xf32>
    %c1 = arith.constant 1 : index
    %c0_10 = arith.constant 0 : index
    %c0_11 = arith.constant 0 : index
    %13 = vector.load %arg4[%c1, %c0_10, %c0_11] : memref<3x32x32xbf16, #tpu.memory_space<vmem>>, vector<1x32x32xbf16>
    %14 = vector.shape_cast %13 : vector<1x32x32xbf16> to vector<32x32xbf16>
    %cst_12 = arith.constant dense<0.000000e+00> : vector<64x32xf32>
    %15 = tpu.matmul %9, %14, %cst_12 {dimension_numbers = #tpu.dot_dimension_numbers<[1], [0], [0], [1], [0, 0, 1, 1], [], []>} : vector<64x32xbf16>, vector<32x32xbf16>, vector<64x32xf32> -> vector<64x32xf32>
    %c2 = arith.constant 2 : index
    %c0_13 = arith.constant 0 : index
    %c0_14 = arith.constant 0 : index
    %16 = vector.load %arg4[%c2, %c0_13, %c0_14] : memref<3x32x32xbf16, #tpu.memory_space<vmem>>, vector<1x32x32xbf16>
    %17 = vector.shape_cast %16 : vector<1x32x32xbf16> to vector<32x32xbf16>
    %cst_15 = arith.constant dense<0.000000e+00> : vector<64x32xf32>
    %18 = tpu.matmul %9, %17, %cst_15 {dimension_numbers = #tpu.dot_dimension_numbers<[1], [0], [0], [1], [0, 0, 1, 1], [], []>} : vector<64x32xbf16>, vector<32x32xbf16>, vector<64x32xf32> -> vector<64x32xf32>
    %19 = tpu.iota {dimensions = array<i32: 0>} : vector<64x1xi32>
    %c31_i32 = arith.constant 31 : i32
    %20 = vector.broadcast %c31_i32 : i32 to vector<64x1xi32>
    %21 = arith.andi %19, %20 : vector<64x1xi32>
    %c0_i32 = arith.constant 0 : i32
    %22 = vector.broadcast %c0_i32 : i32 to vector<64x1xi32>
    %23 = arith.cmpi ne, %21, %22 : vector<64x1xi32>
    %c1_i32 = arith.constant 1 : i32
    %24 = tpu.dynamic_rotate %12 by %c1_i32 dim 0 : vector<64x32xf32>, i32 -> vector<64x32xf32>
    %cst_16 = arith.constant 0.000000e+00 : f32
    %25 = vector.shape_cast %23 : vector<64x1xi1> to vector<64x1xi1>
    %26 = vector.broadcast %25 : vector<64x1xi1> to vector<64x32xi1>
    %27 = vector.broadcast %cst_16 : f32 to vector<64x32xf32>
    %28 = arith.select %26, %24, %27 : vector<64x32xi1>, vector<64x32xf32>
    %c31_i32_17 = arith.constant 31 : i32
    %29 = vector.broadcast %c31_i32_17 : i32 to vector<64x1xi32>
    %30 = arith.cmpi ne, %21, %29 : vector<64x1xi32>
    %c63_i32 = arith.constant 63 : i32
    %31 = tpu.dynamic_rotate %18 by %c63_i32 dim 0 : vector<64x32xf32>, i32 -> vector<64x32xf32>
    %cst_18 = arith.constant 0.000000e+00 : f32
    %32 = vector.shape_cast %30 : vector<64x1xi1> to vector<64x1xi1>
    %33 = vector.broadcast %32 : vector<64x1xi1> to vector<64x32xi1>
    %34 = vector.broadcast %cst_18 : f32 to vector<64x32xf32>
    %35 = arith.select %33, %31, %34 : vector<64x32xi1>, vector<64x32xf32>
    %36 = arith.addf %28, %15 : vector<64x32xf32>
    %37 = arith.addf %36, %35 : vector<64x32xf32>
    %c0_19 = arith.constant 0 : index
    %c0_20 = arith.constant 0 : index
    %38 = vector.load %arg5[%c0_19, %c0_20] : memref<1x32xf32, #tpu.memory_space<vmem>>, vector<1x32xf32>
    %39 = vector.broadcast %38 : vector<1x32xf32> to vector<64x32xf32>
    %40 = arith.addf %37, %39 : vector<64x32xf32>
    %cst_21 = arith.constant 0.000000e+00 : f32
    %41 = vector.broadcast %cst_21 : f32 to vector<64x32xf32>
    %42 = arith.maximumf %40, %41 : vector<64x32xf32>
    %43 = arith.truncf %42 : vector<64x32xf32> to vector<64x32xbf16>
    %c0_22 = arith.constant 0 : index
    %c0_23 = arith.constant 0 : index
    %44 = vector.load %arg6[%c0_22, %c0_23] : memref<32x128xbf16, #tpu.memory_space<vmem>>, vector<32x128xbf16>
    %cst_24 = arith.constant dense<0.000000e+00> : vector<64x128xf32>
    %45 = tpu.matmul %43, %44, %cst_24 {dimension_numbers = #tpu.dot_dimension_numbers<[1], [0], [0], [1], [0, 0, 1, 1], [], []>} : vector<64x32xbf16>, vector<32x128xbf16>, vector<64x128xf32> -> vector<64x128xf32>
    %c0_25 = arith.constant 0 : index
    %c0_26 = arith.constant 0 : index
    %46 = vector.load %arg7[%c0_25, %c0_26] : memref<1x128xf32, #tpu.memory_space<vmem>>, vector<1x128xf32>
    %47 = vector.broadcast %46 : vector<1x128xf32> to vector<64x128xf32>
    %48 = arith.addf %45, %47 : vector<64x128xf32>
    %c0_27 = arith.constant 0 : index
    %c0_28 = arith.constant 0 : index
    %49 = vector.load %arg8[%c0_27, %c0_28] : memref<64x128xbf16, #tpu.memory_space<vmem>>, vector<64x128xbf16>
    %cst_29 = arith.constant dense<0.000000e+00> : vector<64x128xf32>
    %50 = tpu.matmul %1, %49, %cst_29 {dimension_numbers = #tpu.dot_dimension_numbers<[1], [0], [0], [1], [0, 0, 1, 1], [], []>} : vector<64x64xbf16>, vector<64x128xbf16>, vector<64x128xf32> -> vector<64x128xf32>
    %c0_30 = arith.constant 0 : index
    %c0_31 = arith.constant 0 : index
    %51 = vector.load %arg9[%c0_30, %c0_31] : memref<1x128xf32, #tpu.memory_space<vmem>>, vector<1x128xf32>
    %52 = vector.broadcast %51 : vector<1x128xf32> to vector<64x128xf32>
    %53 = arith.addf %50, %52 : vector<64x128xf32>
    %54 = arith.addf %48, %53 : vector<64x128xf32>
    %cst_32 = arith.constant 0.000000e+00 : f32
    %55 = vector.broadcast %cst_32 : f32 to vector<64x128xf32>
    %56 = arith.maximumf %54, %55 : vector<64x128xf32>
    %c0_33 = arith.constant 0 : index
    %c0_34 = arith.constant 0 : index
    %57 = vector.load %arg10[%c0_33, %c0_34] : memref<64x128xf32, #tpu.memory_space<vmem>>, vector<64x128xf32>
    tpu.vector_store %arg10[%c0_33, %c0_34], %56 {strides = array<i32>} : memref<64x128xf32, #tpu.memory_space<vmem>>, vector<64x128xf32>,
    return
  }
  func.func @transform_0(%arg0: i32) -> (i32, i32) {
    %c0_i32 = arith.constant 0 : i32
    %c0_i32_0 = arith.constant 0 : i32
    return %arg0, %c0_i32 : i32, i32
  }
  func.func @transform_1(%arg0: i32) -> (i32, i32) {
    %c0_i32 = arith.constant 0 : i32
    %c0_i32_0 = arith.constant 0 : i32
    %c0_i32_1 = arith.constant 0 : i32
    return %c0_i32, %c0_i32_0 : i32, i32
  }
  func.func @transform_2(%arg0: i32) -> (i32, i32) {
    %c0_i32 = arith.constant 0 : i32
    %c0_i32_0 = arith.constant 0 : i32
    %c0_i32_1 = arith.constant 0 : i32
    return %c0_i32, %c0_i32_0 : i32, i32
  }
  func.func @transform_3(%arg0: i32) -> (i32, i32, i32) {
    %c0_i32 = arith.constant 0 : i32
    %c0_i32_0 = arith.constant 0 : i32
    %c0_i32_1 = arith.constant 0 : i32
    %c0_i32_2 = arith.constant 0 : i32
    return %c0_i32, %c0_i32_0, %c0_i32_1 : i32, i32, i32
  }
  func.func @transform_4(%arg0: i32) -> (i32, i32) {
    %c0_i32 = arith.constant 0 : i32
    %c0_i32_0 = arith.constant 0 : i32
    %c0_i32_1 = arith.constant 0 : i32
    return %c0_i32, %c0_i32_0 : i32, i32
  }
  func.func @transform_5(%arg0: i32) -> (i32, i32) {
    %c0_i32 = arith.constant 0 : i32
    %c0_i32_0 = arith.constant 0 : i32
    %c0_i32_1 = arith.constant 0 : i32
    return %c0_i32, %c0_i32_0 : i32, i32
  }
  func.func @transform_6(%arg0: i32) -> (i32, i32) {
    %c0_i32 = arith.constant 0 : i32
    %c0_i32_0 = arith.constant 0 : i32
    %c0_i32_1 = arith.constant 0 : i32
    return %c0_i32, %c0_i32_0 : i32, i32
  }
  func.func @transform_7(%arg0: i32) -> (i32, i32) {
    %c0_i32 = arith.constant 0 : i32
    %c0_i32_0 = arith.constant 0 : i32
    %c0_i32_1 = arith.constant 0 : i32
    return %c0_i32, %c0_i32_0 : i32, i32
  }
  func.func @transform_8(%arg0: i32) -> (i32, i32) {
    %c0_i32 = arith.constant 0 : i32
    %c0_i32_0 = arith.constant 0 : i32
    %c0_i32_1 = arith.constant 0 : i32
    return %c0_i32, %c0_i32_0 : i32, i32
  }
  func.func @transform_9(%arg0: i32) -> (i32, i32) {
    %c0_i32 = arith.constant 0 : i32
    %c0_i32_0 = arith.constant 0 : i32
    return %arg0, %c0_i32 : i32, i32
  }
}

</mosaic_0001>

<bundles_post_ra>
// kernel: tpu_custom_call.1
= control target key start
LH: loop header
LB: loop body
LE: loop exit
PB: predicated region body
PF: predicated region fallthrough
CT: control target
= control target key end

     0   :  { %14 = vsyncpa [#allocation3], 0  ;;  %s1402_s0 = inlined_call_operand.hbm [shape: f32[64,64], index: 0, kind: input, shape index: {}]   ;;  %s1403_s1 = inlined_call_operand.vmem [shape: bf16[64,32], index: 1, kind: input, shape index: {}]   ;;  %s1404_s2 = inlined_call_operand.vmem [shape: f32[1,32], index: 2, kind: input, shape index: {}]   ;;  %s1405_s3 = inlined_call_operand.vmem [shape: bf16[3,32,32], index: 3, kind: input, shape index: {}]   ;;  %s1406_s4 = inlined_call_operand.vmem [shape: f32[1,32], index: 4, kind: input, shape index: {}]   ;;  %s1407_s5 = inlined_call_operand.vmem [shape: bf16[32,128], index: 5, kind: input, shape index: {}]   ;;  %s1408_s6 = inlined_call_operand.vmem [shape: f32[1,128], index: 6, kind: input, shape index: {}]   ;;  %s1409_s7 = inlined_call_operand.hbm [shape: bf16[64,128], index: 7, kind: input, shape index: {}]   ;;  %s1410_s8 = inlined_call_operand.vmem [shape: f32[1,128], index: 8, kind: input, shape index: {}]   ;;  %s1411_s9 = inlined_call_operand.hbm [shape: f32[64,128], index: 9, kind: output, shape index: {}]  }
   0x1   :  { %15 = vsyncpa [#allocation6], 0 }
   0x2   :  { %16 = vsyncpa [#allocation4], 0  ;;  %s1156_s30 = smov [#allocation2]   ;;  %s1084_s13 = scalar_lea.hbm %s1402_s0, 1024 }
   0x3   :  { %s22_s10 = sshll.u32 %s1156_s30, 4  ;;  %p1085_p0 = scmp.ne.s32.totalorder %s1402_s0, %s1084_s13  ;;  %s23_s10 = int_to_ptr.vmem [resolvable:$true] %s22_s10 }
   0x4   :  { %p1088_p1 = scmp.lt.u32.totalorder %s1084_s13, %s1402_s0 }
   0x6   :  { %p1090_p2 = pnand %p1088_p1, %p1085_p0 }
   0x8   :  { %1093 = shalt.err (!%p1090_p2)
}
   0x9   :  { %s1094_s18 = scalar_lea.vmem %s23_s10, 1024  ;;  %p1099_p4 = scmp.lt.s32.totalorder %s23_s10, %s23_s10 }
   0xa   :  { %p1095_p3 = scmp.ne.s32.totalorder %s23_s10, %s1094_s18  ;;  %p1100_p5 = scmp.lt.s32.totalorder %s1094_s18, %s1094_s18 }
   0xc   :  { %p1101_p6 = por %p1100_p5, %p1099_p4 }
   0xe   :  { %p1102_p7 = pnand %p1101_p6, %p1095_p3 }
  0x10   :  { %1105 = shalt.err (!%p1102_p7)
}
  0x11   :  { %s1157_s19 = smov 128   ;;  %s1158_s20 = smov 8  }
  0x12   :  { %28 = dma.hbm_to_vmem [thread:$0]  %s1402_s0, 1024, %s23_s10, [#allocation3], %s1157_s19, %s1157_s19, %s1158_s20  }
  0x13   :  { %s1159_s23 = smov [#allocation5]   ;;  %s1106_s27 = scalar_lea.hbm %s1409_s7, 512 }
  0x14   :  { %s46_s24 = sshll.u32 %s1159_s23, 4  ;;  %p1107_p8 = scmp.ne.s32.totalorder %s1409_s7, %s1106_s27  ;;  %s47_s24 = int_to_ptr.vmem [resolvable:$true] %s46_s24 }
  0x15   :  { %p1110_p9 = scmp.lt.u32.totalorder %s1106_s27, %s1409_s7 }
  0x17   :  { %p1112_p10 = pnand %p1110_p9, %p1107_p8 }
  0x19   :  { %1115 = shalt.err (!%p1112_p10)
}
  0x1a   :  { %s1116_s12 = scalar_lea.vmem %s47_s24, 512  ;;  %p1121_p12 = scmp.lt.s32.totalorder %s47_s24, %s47_s24 }
  0x1b   :  { %p1117_p11 = scmp.ne.s32.totalorder %s47_s24, %s1116_s12  ;;  %p1122_p13 = scmp.lt.s32.totalorder %s1116_s12, %s1116_s12 }
  0x1d   :  { %p1123_p0 = por %p1122_p13, %p1121_p12 }
  0x1f   :  { %p1124_p1 = pnand %p1123_p0, %p1117_p11 }
  0x21   :  { %1127 = shalt.err (!%p1124_p1)
}
  0x22   :  { %s1160_s0 = smov 64   ;;  %s1161_s10 = smov 4  }
  0x23   :  { %52 = dma.hbm_to_vmem [thread:$0]  %s1409_s7, 512, %s47_s24, [#allocation6], %s1160_s0, %s1160_s0, %s1161_s10  }
  0x24   :  { %1150 = dma.done.wait [#allocation3], 1024  }
  0x25   :  { %1151 = vsyncadd [#allocation3], 4294966272 }
  0x26   :  { %1152 = dma.done.wait [#allocation6], 512  }
  0x27   :  { %1153 = vsyncadd [#allocation6], 4294966784  ;;  %v1068_v0 = vld [vmem:[%s1403_s1] sm:$0xff]   ;;  %v1069_v1 = vld [vmem:[%s1403_s1 + $0x8] sm:$0xff]   ;;  %vm113_vm0 = vcmask 523264   ;;  %vm219_vm1 = vcmask 261120   ;;  %v461_v54 = vlaneseq }
  0x28   :  { %957 = vmatprep.subr.bf16.mxu0 %v1068_v0  ;;  %v1070_v2 = vld [vmem:[%s1403_s1 + $0x10] sm:$0xff]   ;;  %v62_v3 = vld [vmem:[#allocation2] sm:$0xff]  ;;  %v63_v4 = vld [vmem:[#allocation2 + $0x8] sm:$0xff] }
  0x29   :  { %958 = vmatpush3.bf16.msra.mxu0 %v1068_v0  ;;  %v1249_v5 = vpack.c.bf16 %v63_v4, %v62_v3  ;;  %v1071_v6 = vld [vmem:[%s1403_s1 + $0x18] sm:$0xff]   ;;  %v64_v7 = vld [vmem:[#allocation2 + $0x10] sm:$0xff]  ;;  %v66_v9 = vld [vmem:[#allocation2 + $0x20] sm:$0xff]  ;;  %v1310_v55 = vshrl.u32 %v461_v54, 7 }
  0x2a   :  { %959 = vmatprep.subr.bf16.mxu0 %v1069_v1  ;;  %v65_v8 = vld [vmem:[#allocation2 + $0x18] sm:$0xff]  ;;  %v67_v10 = vld [vmem:[#allocation2 + $0x28] sm:$0xff]  ;;  %v1072_v11 = vld [vmem:[%s1405_s3] sm:$0xff]  }
  0x2b   :  { %965 = vmatprep.mubr.msk.bf16.mxu0 %vm113_vm0, %v1249_v5  ;;  %v1259_v12 = vpack.c.bf16 %v65_v8, %v64_v7  ;;  %v1261_v13 = vpack.c.bf16 %v67_v10, %v66_v9  ;;  %v68_v14 = vld [vmem:[#allocation2 + $0x30] sm:$0xff]  ;;  %v69_v15 = vld [vmem:[#allocation2 + $0x38] sm:$0xff]  ;;  %v1073_v18 = vld [vmem:[%s1405_s3 + $0x8] sm:$0xff]   ;;  %vm494_vm2 = vcmp.lt.s32.totalorder %v1310_v55, 1  ;;  %v466_v62 = vadd.s32 32, %v1310_v55 }
  0x2c   :  { %v1267_v16 = vpack.c.bf16 %v69_v15, %v68_v14  ;;  %v1074_v17 = vld [vmem:[%s1405_s3 + $0x10] sm:$0xff]   ;;  %v1075_v19 = vld [vmem:[%s1405_s3 + $0x18] sm:$0xff]   ;;  %v1076_v20 = vld [vmem:[%s1405_s3 + $0x20] sm:$0xff]   ;;  %v470_v15 = vand.u32 31, %v1310_v55  ;;  %vm543_vm5 = vcmp.lt.s32.totalorder %v1310_v55, 7 }
  0x2d   :  { %960 = vmatpush3.bf16.msra.mxu0 %v1069_v1  ;;  %985 = vmatprep.subr.bf16.mxu1 %v1074_v17  ;;  %v865_v21 = vld [vmem:[%s1404_s2] ss:$0 sm:$0xff]  ;;  %v1077_v39 = vld [vmem:[%s1405_s3 + $0x28] sm:$0xff]   ;;  %v474_v10 = vand.u32 31, %v466_v62 }
  0x2e   :  { %961 = vmatprep.subr.bf16.mxu0 %v1070_v2  ;;  %986 = vmatpush3.bf16.msra.mxu1 %v1074_v17  ;;  %v1078_v51 = vld [vmem:[%s1407_s5] sm:$0xff]   ;;  %v1079_v52 = vld [vmem:[%s1407_s5 + $0x8] sm:$0xff]   ;;  %vm478_vm4 = vcmp.ne.s32.totalorder %v470_v15, 0 }
  0x2f   :  { %987 = vmatprep.subr.bf16.mxu1 %v1075_v19  ;;  %v1307_v53 = vld [vmem:[#allocation5] sm:$0xff]   ;;  %vm482_vm3 = vcmp.ne.s32.totalorder %v474_v10, 0 }
  0x31   :  { %962 = vmatpush3.bf16.msra.mxu0 %v1070_v2 }
  0x32   :  { %963 = vmatprep.subr.bf16.mxu0 %v1071_v6  ;;  %988 = vmatpush3.bf16.msra.mxu1 %v1075_v19 }
  0x33   :  { %1009 = vmatprep.subr.bf16.mxu1 %v1078_v51 }
  0x35   :  { %964 = vmatpush3.bf16.msra.mxu0 %v1071_v6 }
  0x36   :  { %973 = vmatprep.subr.bf16.mxu0 %v1072_v11 }
  0x38   :  { %966 = vmatmul.mubr.msk.bf16.vlgmr.msra.gmra.mrb[0].mxu0 %vm113_vm0, %v1259_v12 }
  0x39   :  { %969 = vmatprep.mubr.msk.bf16.mxu0 %vm113_vm0, %v1261_v13  ;;  %974 = vmatpush3.bf16.msra.mxu0 %v1072_v11 }
  0x3a   :  { %975 = vmatprep.subr.bf16.mxu0 %v1073_v18 }
  0x3d   :  { %976 = vmatpush3.bf16.msra.mxu0 %v1073_v18 }
  0x3e   :  { %997 = vmatprep.subr.bf16.mxu0 %v1076_v20 }
  0x40   :  { %970 = vmatmul.mubr.msk.bf16.gmra.mrb[4].mxu0 %vm113_vm0, %v1267_v16 }
 0x10b   :  { %v967_v22 = vpop.f32.mrb[0].mxu0 }
 0x10c   :  { %v169_v23 = vadd.f32 %v967_v22, %v865_v21  ;;  %v160_v24 = vpop.f32.mrb[1].mxu0 }
 0x10d   :  { %v161_v25 = vadd.f32 %v865_v21, %v160_v24  ;;  %v968_v26 = vpop.f32.mrb[2].mxu0 }
 0x10e   :  { %v172_v27 = vadd.f32 %v968_v26, %v865_v21  ;;  %v163_v28 = vpop.f32.mrb[3].mxu0  ;;  %v193_v30 = vmax.f32 %v169_v23, 0.0 }
 0x10f   :  { %v164_v29 = vadd.f32 %v865_v21, %v163_v28  ;;  %v191_v32 = vmax.f32 %v161_v25, 0.0 }
 0x110   :  { %v194_v31 = vmax.f32 %v172_v27, 0.0 }
 0x111   :  { %v192_v33 = vmax.f32 %v164_v29, 0.0 }
 0x112   :  { %v200_v34 = vpack.c.bf16 %v194_v31, %v193_v30 }
 0x113   :  { %v199_v35 = vpack.c.bf16 %v192_v33, %v191_v32  ;;  %v971_v36 = vpop.f32.mrb[4].mxu0 }
 0x114   :  { %v185_v37 = vadd.f32 %v971_v36, %v865_v21  ;;  %v176_v38 = vpop.f32.mrb[5].mxu0 }
 0x115   :  { %v177_v40 = vadd.f32 %v865_v21, %v176_v38  ;;  %v972_v41 = vpop.f32.mrb[6].mxu0  ;;  %977 = vmatprep.mubr.msk.bf16.mxu0 %vm219_vm1, %v199_v35  ;;  %989 = vmatprep.mubr.msk.bf16.mxu1 %vm219_vm1, %v199_v35 }
 0x116   :  { %v188_v42 = vadd.f32 %v972_v41, %v865_v21  ;;  %v179_v43 = vpop.f32.mrb[7].mxu0  ;;  %978 = vmatmul.mubr.msk.bf16.vlgmr.msra.gmra.mrb[8].mxu0 %vm219_vm1, %v200_v34  ;;  %990 = vmatmul.mubr.msk.bf16.vlgmr.msra.gmra.mrb[0].mxu1 %vm219_vm1, %v200_v34  ;;  %v197_v45 = vmax.f32 %v185_v37, 0.0 }
 0x117   :  { %v180_v44 = vadd.f32 %v865_v21, %v179_v43  ;;  %998 = vmatpush3.bf16.msra.mxu0 %v1076_v20  ;;  %v195_v47 = vmax.f32 %v177_v40, 0.0  ;;  %1010 = vmatpush3.bf16.msra.mxu1 %v1078_v51  ;;  %v465_v43 = vadd.s32 24, %v1310_v55 }
 0x118   :  { %v198_v46 = vmax.f32 %v188_v42, 0.0  ;;  %999 = vmatprep.subr.bf16.mxu0 %v1077_v39  ;;  %1011 = vmatprep.subr.bf16.mxu1 %v1079_v52 }
 0x119   :  { %v196_v48 = vmax.f32 %v180_v44, 0.0 }
 0x11a   :  { %v202_v49 = vpack.c.bf16 %v198_v46, %v197_v45  ;;  %v469_v45 = vadd.s32 56, %v1310_v55 }
 0x11b   :  { %v201_v50 = vpack.c.bf16 %v196_v48, %v195_v47  ;;  %1000 = vmatpush3.bf16.msra.mxu0 %v1077_v39  ;;  %1012 = vmatpush3.bf16.msra.mxu1 %v1079_v52  ;;  %v473_v52 = vand.u32 31, %v465_v43 }
 0x11c   :  { %1021 = vmatprep.subr.bf16.mxu1 %v1307_v53 }
 0x11d   :  { %981 = vmatprep.mubr.msk.bf16.mxu0 %vm219_vm1, %v201_v50  ;;  %993 = vmatprep.mubr.msk.bf16.mxu1 %vm219_vm1, %v201_v50  ;;  %vm1345_vm6 = vcmp.ne.s32.totalorder %v473_v52, 31 }
 0x11e   :  { %982 = vmatmul.mubr.msk.bf16.gmra.mrb[12].mxu0 %vm219_vm1, %v202_v49  ;;  %994 = vmatmul.mubr.msk.bf16.gmra.mrb[4].mxu1 %vm219_vm1, %v202_v49 }
 0x11f   :  { %1001 = vmatprep.mubr.msk.bf16.mxu0 %vm219_vm1, %v199_v35 }
 0x126   :  { %1002 = vmatmul.mubr.msk.bf16.vlgmr.msra.gmra.mrb[16].mxu0 %vm219_vm1, %v200_v34 }
 0x127   :  { %1005 = vmatprep.mubr.msk.bf16.mxu0 %vm219_vm1, %v201_v50 }
 0x12e   :  { %1006 = vmatmul.mubr.msk.bf16.gmra.mrb[20].mxu0 %vm219_vm1, %v202_v49 }
 0x1e9   :  { %v979_v56 = vpop.f32.mrb[8].mxu0  ;;  %v991_v57 = vpop.f32.mrb[0].mxu1 }
 0x1ea   :  { %v266_v58 = vpop.f32.mrb[9].mxu0  ;;  %v348_v59 = vpop.f32.mrb[1].mxu1  ;;  %v488_v63 = vrot.slane %v979_v56, 7  ;;  %v900_v56 = vld [vmem:[%s1406_s4] ss:$0 sm:$0xff] }
 0x1eb   :  { %v980_v60 = vpop.f32.mrb[10].mxu0  ;;  %v992_v61 = vpop.f32.mrb[2].mxu1  ;;  %v486_v3 = vrot.slane %v266_v58, 7 }
 0x1ec   :  { %v489_v0 = vrot.slane %v980_v60, 7  ;;  %v269_v1 = vpop.f32.mrb[11].mxu0  ;;  %v351_v2 = vpop.f32.mrb[3].mxu1 }
 0x1ed   :  { %v487_v4 = vrot.slane %v269_v1, 7 }
 0x1ee   :  { %v499_v6 = vsel %vm494_vm2, %v488_v63, %v489_v0 }
 0x1ef   :  { %v1316_v7 = vadd.f32 %v992_v61, %v499_v6  ;;  %v500_v8 = vsel %vm494_vm2, %v487_v4, %v488_v63  ;;  %v501_v9 = vsel %vm494_vm2, %v486_v3, %v487_v4 }
 0x1f0   :  { %v578_v11 = vadd.f32 %v991_v57, %v500_v8  ;;  %v577_v14 = vadd.f32 %v501_v9, %v351_v2 }
 0x1f1   :  { %v983_v17 = vpop.f32.mrb[12].mxu0  ;;  %v995_v18 = vpop.f32.mrb[4].mxu1 }
 0x1f2   :  { %v282_v19 = vpop.f32.mrb[13].mxu0  ;;  %v364_v20 = vpop.f32.mrb[5].mxu1  ;;  %v492_v24 = vrot.slane %v983_v17, 7 }
 0x1f3   :  { %v490_v21 = vrot.slane %v282_v19, 7  ;;  %v984_v22 = vpop.f32.mrb[14].mxu0  ;;  %v996_v23 = vpop.f32.mrb[6].mxu1 }
 0x1f4   :  { %v493_v25 = vrot.slane %v984_v22, 7  ;;  %v285_v26 = vpop.f32.mrb[15].mxu0  ;;  %v367_v27 = vpop.f32.mrb[7].mxu1 }
 0x1f5   :  { %v498_v28 = vsel %vm494_vm2, %v489_v0, %v490_v21  ;;  %v491_v29 = vrot.slane %v285_v26, 7 }
 0x1f6   :  { %v523_v30 = vsel %vm482_vm3, %v498_v28, 0.0  ;;  %v502_v31 = vsel %vm494_vm2, %v493_v25, %v486_v3  ;;  %v495_v32 = vsel %vm494_vm2, %v492_v24, %v493_v25 }
 0x1f7   :  { %v580_v33 = vadd.f32 %v523_v30, %v364_v20  ;;  %v519_v34 = vsel %vm478_vm4, %v502_v31, 0.0  ;;  %v583_v35 = vadd.f32 %v996_v23, %v495_v32  ;;  %v496_v36 = vsel %vm494_vm2, %v491_v29, %v492_v24 }
 0x1f8   :  { %v576_v37 = vadd.f32 %v519_v34, %v348_v59  ;;  %v582_v38 = vadd.f32 %v995_v18, %v496_v36  ;;  %v497_v39 = vsel %vm494_vm2, %v490_v21, %v491_v29  ;;  %v477_v59 = vand.u32 31, %v469_v45 }
 0x1f9   :  { %v581_v40 = vadd.f32 %v497_v39, %v367_v27  ;;  %v1003_v41 = vpop.f32.mrb[16].mxu0 }
 0x1fa   :  { %v430_v42 = vpop.f32.mrb[17].mxu0  ;;  %v537_v46 = vrot.slane %v1003_v41, 1  ;;  %vm1349_vm7 = vcmp.ne.s32.totalorder %v477_v59, 31 }
 0x1fb   :  { %v1004_v44 = vpop.f32.mrb[18].mxu0  ;;  %v535_v49 = vrot.slane %v430_v42, 1 }
 0x1fc   :  { %v538_v47 = vrot.slane %v1004_v44, 1  ;;  %v433_v48 = vpop.f32.mrb[19].mxu0 }
 0x1fd   :  { %v536_v50 = vrot.slane %v433_v48, 1 }
 0x1fe   :  { %v548_v51 = vsel %vm543_vm5, %v537_v46, %v538_v47 }
 0x1ff   :  { %v586_v54 = vadd.f32 %v578_v11, %v548_v51  ;;  %v549_v57 = vsel %vm543_vm5, %v536_v50, %v537_v46  ;;  %v550_v58 = vsel %vm543_vm5, %v535_v49, %v536_v50  ;;  %v908_v46 = vld [vmem:[%s1410_s8] ss:$0 sm:$0xff] }
 0x200   :  { %v584_v60 = vadd.f32 %v576_v37, %v550_v58  ;;  %v585_v61 = vadd.f32 %v577_v14, %v549_v57 }
 0x201   :  { %v1007_v62 = vpop.f32.mrb[20].mxu0  ;;  %v601_v14 = vadd.f32 %v900_v56, %v586_v54 }
 0x202   :  { %v599_v63 = vadd.f32 %v900_v56, %v584_v60  ;;  %v600_v0 = vadd.f32 %v900_v56, %v585_v61  ;;  %v446_v1 = vpop.f32.mrb[21].mxu0  ;;  %v541_v10 = vrot.slane %v1007_v62, 1 }
 0x203   :  { %v539_v3 = vrot.slane %v446_v1, 1  ;;  %v1008_v4 = vpop.f32.mrb[22].mxu0 }
 0x204   :  { %v607_v8 = vmax.f32 %v599_v63, 0.0  ;;  %v608_v9 = vmax.f32 %v600_v0, 0.0  ;;  %v542_v11 = vrot.slane %v1008_v4, 1  ;;  %v449_v15 = vpop.f32.mrb[23].mxu0 }
 0x205   :  { %v547_v17 = vsel %vm543_vm5, %v538_v47, %v539_v3  ;;  %v540_v18 = vrot.slane %v449_v15, 1 }
 0x206   :  { %v571_v19 = vsel %vm1345_vm6, %v547_v17, 0.0  ;;  %v544_v20 = vsel %vm543_vm5, %v541_v10, %v542_v11  ;;  %v551_v21 = vsel %vm543_vm5, %v542_v11, %v535_v49  ;;  %v615_v22 = vpack.c.bf16 %v608_v9, %v607_v8 }
 0x207   :  { %v587_v23 = vadd.f32 %v1316_v7, %v571_v19  ;;  %v575_v24 = vsel %vm1349_vm7, %v551_v21, 0.0  ;;  %v590_v25 = vadd.f32 %v582_v38, %v544_v20  ;;  %v545_v26 = vsel %vm543_vm5, %v540_v18, %v541_v10 }
 0x208   :  { %v591_v27 = vadd.f32 %v583_v35, %v575_v24  ;;  %v546_v28 = vsel %vm543_vm5, %v539_v3, %v540_v18  ;;  %v589_v29 = vadd.f32 %v581_v40, %v545_v26  ;;  %1013 = vmatprep.mubr.msk.bf16.mxu1 %vm219_vm1, %v615_v22  ;;  %v609_v7 = vmax.f32 %v601_v14, 0.0  ;;  %v1081_v35 = vld [vmem:[#allocation5 + $0x8] sm:$0xff]   ;;  %v1083_v40 = vld [vmem:[#allocation5 + $0x18] sm:$0xff]  }
 0x209   :  { %v602_v30 = vadd.f32 %v900_v56, %v587_v23  ;;  %v605_v31 = vadd.f32 %v900_v56, %v590_v25  ;;  %v588_v32 = vadd.f32 %v580_v33, %v546_v28  ;;  %v1082_v33 = vld [vmem:[#allocation5 + $0x10] sm:$0xff]  }
 0x20a   :  { %v606_v34 = vadd.f32 %v900_v56, %v591_v27  ;;  %v604_v36 = vadd.f32 %v900_v56, %v589_v29 }
 0x20b   :  { %v610_v37 = vmax.f32 %v602_v30, 0.0  ;;  %v613_v39 = vmax.f32 %v605_v31, 0.0  ;;  %v603_v41 = vadd.f32 %v900_v56, %v588_v32 }
 0x20c   :  { %v612_v38 = vmax.f32 %v604_v36, 0.0  ;;  %v614_v42 = vmax.f32 %v606_v34, 0.0 }
 0x20d   :  { %v616_v43 = vpack.c.bf16 %v610_v37, %v609_v7  ;;  %v611_v44 = vmax.f32 %v603_v41, 0.0 }
 0x20e   :  { %v618_v45 = vpack.c.bf16 %v614_v42, %v613_v39 }
 0x20f   :  { %1014 = vmatmul.mubr.msk.bf16.vlgmr.msra.gmra.mrb[8].mxu1 %vm219_vm1, %v616_v43  ;;  %v617_v55 = vpack.c.bf16 %v612_v38, %v611_v44 }
 0x210   :  { %1022 = vmatpush3.bf16.msra.mxu1 %v1307_v53  ;;  %v901_v53 = vld [vmem:[%s1408_s6] ss:$0 sm:$0xff]  ;;  %s1162_s6 = smov [#allocation7]  }
 0x211   :  { %1017 = vmatprep.mubr.msk.bf16.mxu1 %vm219_vm1, %v617_v55  ;;  %1023 = vmatprep.subr.bf16.mxu1 %v1081_v35  ;;  %s852_s8 = sshll.u32 %s1162_s6, 4  ;;  %s853_s8 = int_to_ptr.vmem [resolvable:$true] %s852_s8 }
 0x212   :  { %s1128_s7 = scalar_lea.vmem %s853_s8, 1024  ;;  %p1133_p3 = scmp.lt.s32.totalorder %s853_s8, %s853_s8 }
 0x213   :  { %p1129_p2 = scmp.ne.s32.totalorder %s853_s8, %s1128_s7  ;;  %p1134_p4 = scmp.lt.s32.totalorder %s1128_s7, %s1128_s7 }
 0x214   :  { %1024 = vmatpush3.bf16.msra.mxu1 %v1081_v35 }
 0x215   :  { %1025 = vmatprep.subr.bf16.mxu1 %v1082_v33  ;;  %p1135_p5 = por %p1134_p4, %p1133_p3 }
 0x217   :  { %1018 = vmatmul.mubr.msk.bf16.gmra.mrb[12].mxu1 %vm219_vm1, %v618_v45  ;;  %p1136_p6 = pnand %p1135_p5, %p1129_p2 }
 0x218   :  { %1026 = vmatpush3.bf16.msra.mxu1 %v1082_v33  ;;  %1029 = vmatprep.mubr.msk.bf16.mxu1 %vm113_vm0, %v1249_v5  ;;  %v1043_v5 = vadd.f32 %v908_v46, %v901_v53 }
 0x219   :  { %1027 = vmatprep.subr.bf16.mxu1 %v1083_v40 }
 0x21c   :  { %1028 = vmatpush3.bf16.msra.mxu1 %v1083_v40 }
 0x21f   :  { %1030 = vmatmul.mubr.msk.bf16.vlgmr.msra.gmra.mrb[8].mxu1 %vm113_vm0, %v1259_v12 }
 0x220   :  { %1033 = vmatprep.mubr.msk.bf16.mxu1 %vm113_vm0, %v1261_v13 }
 0x227   :  { %1034 = vmatmul.mubr.msk.bf16.gmra.mrb[12].mxu1 %vm113_vm0, %v1267_v16 }
 0x2f2   :  { %v1031_v47 = vpop.f32.mrb[8].mxu1 }
 0x2f3   :  { %v1037_v48 = vadd.f32 %v1031_v47, %v901_v53  ;;  %v792_v49 = vpop.f32.mrb[9].mxu1 }
 0x2f4   :  { %v1039_v50 = vadd.f32 %v901_v53, %v792_v49  ;;  %v1032_v12 = vpop.f32.mrb[10].mxu1 }
 0x2f5   :  { %v1038_v51 = vadd.f32 %v1037_v48, %v908_v46  ;;  %v1042_v52 = vadd.f32 %v1043_v5, %v1032_v12  ;;  %v795_v13 = vpop.f32.mrb[11].mxu1 }
 0x2f6   :  { %v1040_v54 = vadd.f32 %v1039_v50, %v908_v46  ;;  %v1044_v56 = vadd.f32 %v1043_v5, %v795_v13 }
 0x2f7   :  { %v833_v16 = vmax.f32 %v1038_v51, 0.0  ;;  %v834_v57 = vmax.f32 %v1042_v52, 0.0 }
 0x2f8   :  { %v831_v58 = vmax.f32 %v1040_v54, 0.0  ;;  %v832_v59 = vmax.f32 %v1044_v56, 0.0 }
 0x2f9   :  { %841 = vst [vmem:[#allocation7 + $0x10] sm:$0xff] %v833_v16  ;;  %842 = vst [vmem:[#allocation7 + $0x18] sm:$0xff] %v834_v57 }
 0x2fa   :  { %839 = vst [vmem:[#allocation7] sm:$0xff] %v831_v58  ;;  %840 = vst [vmem:[#allocation7 + $0x8] sm:$0xff] %v832_v59  ;;  %v1035_v60 = vpop.f32.mrb[12].mxu1 }
 0x2fb   :  { %v1046_v61 = vadd.f32 %v1043_v5, %v1035_v60  ;;  %v808_v62 = vpop.f32.mrb[13].mxu1 }
 0x2fc   :  { %v1048_v63 = vadd.f32 %v1043_v5, %v808_v62  ;;  %v1036_v0 = vpop.f32.mrb[14].mxu1 }
 0x2fd   :  { %v837_v1 = vmax.f32 %v1046_v61, 0.0  ;;  %v1050_v2 = vadd.f32 %v1043_v5, %v1036_v0  ;;  %v811_v3 = vpop.f32.mrb[15].mxu1 }
 0x2fe   :  { %v835_v4 = vmax.f32 %v1048_v63, 0.0  ;;  %v1052_v6 = vadd.f32 %v1043_v5, %v811_v3 }
 0x2ff   :  { %845 = vst [vmem:[#allocation7 + $0x30] sm:$0xff] %v837_v1  ;;  %v838_v8 = vmax.f32 %v1050_v2, 0.0 }
 0x300   :  { %843 = vst [vmem:[#allocation7 + $0x20] sm:$0xff] %v835_v4  ;;  %v836_v9 = vmax.f32 %v1052_v6, 0.0 }
 0x301   :  { %846 = vst [vmem:[#allocation7 + $0x38] sm:$0xff] %v838_v8 }
 0x302   :  { %844 = vst [vmem:[#allocation7 + $0x28] sm:$0xff] %v836_v9 }
 0x303   :  { %1139 = shalt.err (!%p1136_p6)
}
 0x304   :  { %s1140_s25 = scalar_lea.hbm %s1411_s9, 1024 }
 0x305   :  { %p1141_p7 = scmp.ne.s32.totalorder %s1411_s9, %s1140_s25  ;;  %p1144_p8 = scmp.lt.u32.totalorder %s1140_s25, %s1411_s9 }
 0x307   :  { %p1146_p9 = pnand %p1144_p8, %p1141_p7 }
 0x309   :  { %1149 = shalt.err (!%p1146_p9)
}
 0x30a   :  { %858 = dma.vmem_to_hbm [thread:$0]  %s853_s8, 1024, %s1411_s9, [#allocation4], %s1157_s19, %s1157_s19, %s1158_s20  }
 0x30b   :  { %1154 = dma.done.wait [#allocation4], 1024  }
 0x30c   :  { %1155 = vsyncadd [#allocation4], 4294966272 }
 0x30d   :  { %862 = vsyncpa [#allocation3], 1 }
 0x30e   :  { %863 = vsyncpa [#allocation6], 1 }
 0x30f   :  { %864 = vsyncpa [#allocation4], 1 }

</bundles_post_ra>
